<compile_context>
chip_gen: v6e
topology: v6e:2x2x1
jax: 0.10.0
libtpu: 0.0.40
codegen_flags: <defaults>
</compile_context>

<pallas_src>
from functools import partial

import jax
import jax.numpy as jnp
from jax.experimental import pallas as pl
from jax.experimental.pallas import tpu as pltpu

BN_EPS = 1e-5


def _round_up(x, m):
    return ((x + m - 1) // m) * m


# ----------------------------------------------------------------------------
# Pallas kernel: tiled (M,K)@(K,N) + bias + ReLU with f32 VMEM accumulator.
# ----------------------------------------------------------------------------
def _matmul_bias_relu_kernel(p_ref, w_ref, b_ref, o_ref, acc_ref):
    k = pl.program_id(2)

    @pl.when(k == 0)
    def _():
        acc_ref[...] = jnp.zeros_like(acc_ref)

    acc_ref[...] += jnp.dot(p_ref[...], w_ref[...],
                            preferred_element_type=jnp.float32)

    @pl.when(k == pl.num_programs(2) - 1)
    def _():
        o_ref[...] = jnp.maximum(acc_ref[...] + b_ref[...],
                                 0.0).astype(o_ref.dtype)


# ----------------------------------------------------------------------------
# Glue: im2col (bf16) + wrapper around pallas_call
# ----------------------------------------------------------------------------
def _im2col(x, kh, kw, stride, pad):
    """x: (N, H, W, C) -> patches (N*Ho*Wo, kh*kw*C) in x.dtype."""
    N, H, W, C = x.shape
    Ho = (H + 2 * pad - kh) // stride + 1
    Wo = (W + 2 * pad - kw) // stride + 1
    xp = jnp.pad(x, ((0, 0), (pad, pad), (pad, pad), (0, 0)))
    cols = []
    for i in range(kh):
        for j in range(kw):
            cols.append(
                xp[:, i:i + stride * (Ho - 1) + 1:stride,
                      j:j + stride * (Wo - 1) + 1:stride, :])
    patches = jnp.stack(cols, axis=3)  # (N, Ho, Wo, kh*kw, C)
    return patches.reshape(N * Ho * Wo, kh * kw * C), (N, Ho, Wo)


def conv_block_forward(params, x_nchw, *, stride=2, pad=1):
    """ConvBlock forward: ReLU(BN(Conv2d(x))) with NCHW in/out (PyTorch)."""
    w = params["conv_w"]                       # (Cout, Cin, kh, kw)
    conv_b = params["conv_b"]                  # (Cout,)
    bn = params["bn"]
    cout, cin, kh, kw = w.shape

    # NCHW -> NHWC, bf16 (halves HBM bytes for the im2col patches).
    x = jnp.transpose(x_nchw, (0, 2, 3, 1)).astype(jnp.bfloat16)
    patches, (N, Ho, Wo) = _im2col(x, kh, kw, stride, pad)
    M, K = patches.shape

    # Fold BN (inference) + conv bias into the GEMM weight / bias.
    scale = bn["gamma"] / jnp.sqrt(bn["var"] + BN_EPS)             # (Cout,)
    bias = (conv_b - bn["mean"]) * scale + bn["beta"]              # (Cout,)
    # weight -> (kh, kw, Cin, Cout) to match patch ordering, then flatten.
    wm = jnp.transpose(w, (2, 3, 1, 0)).reshape(K, cout) * scale[None, :]

    # ---- tile geometry: lane-dense, (8/16,128)-aligned, modest VMEM use ----
    Mp = _round_up(M, 16)
    tm = min(512, Mp)
    Mp = _round_up(Mp, tm)

    Kp = _round_up(K, 128)
    tk = min(512, Kp)
    Kp = _round_up(Kp, tk)

    Np = _round_up(cout, 128)
    tn = min(256, Np)
    Np = _round_up(Np, tn)

    patches_p = jnp.zeros((Mp, Kp), jnp.bfloat16).at[:M, :K].set(patches)
    wm_p = jnp.zeros((Kp, Np), jnp.bfloat16).at[:K, :cout].set(
        wm.astype(jnp.bfloat16))
    bias_p = jnp.zeros((1, Np), jnp.float32).at[0, :cout].set(
        bias.astype(jnp.float32))

    grid = (Mp // tm, Np // tn, Kp // tk)
    cost = pl.CostEstimate(
        flops=2 * Mp * Kp * Np,
        transcendentals=0,
        bytes_accessed=(Mp * Kp * 2 + Kp * Np * 2 + Np * 4 + Mp * Np * 4),
    )

    out = pl.pallas_call(
        _matmul_bias_relu_kernel,
        out_shape=jax.ShapeDtypeStruct((Mp, Np), jnp.float32),
        grid_spec=pltpu.PrefetchScalarGridSpec(
            num_scalar_prefetch=0,
            grid=grid,
            in_specs=[
                pl.BlockSpec((tm, tk), lambda i, j, k: (i, k)),   # patches
                pl.BlockSpec((tk, tn), lambda i, j, k: (k, j)),   # weight
                pl.BlockSpec((1, tn), lambda i, j, k: (0, j)),    # bias
            ],
            out_specs=pl.BlockSpec((tm, tn), lambda i, j, k: (i, j)),
            scratch_shapes=[pltpu.VMEM((tm, tn), jnp.float32)],
        ),
        compiler_params=pltpu.CompilerParams(
            dimension_semantics=("parallel", "parallel", "arbitrary"),
            vmem_limit_bytes=32 * 1024 * 1024,
        ),
        cost_estimate=cost,
    )(patches_p, wm_p, bias_p)

    out = out[:M, :cout].reshape(N, Ho, Wo, cout)
    return jnp.transpose(out, (0, 3, 1, 2))  # back to NCHW


# ----------------------------------------------------------------------------
# Parameter construction (mirrors ConvBlock.init_weight)
# ----------------------------------------------------------------------------
def init_conv_block_params(key, in_channels, out_channels, kernel_size=3):
    # nn.init.kaiming_normal_(w, a=1): gain = sqrt(2/(1+1^2)) = 1, fan_in mode.
    fan_in = in_channels * kernel_size * kernel_size
    std = 1.0 / (fan_in ** 0.5)
    w = jax.random.normal(
        key, (out_channels, in_channels, kernel_size, kernel_size),
        jnp.float32) * std
    b = jnp.zeros((out_channels,), jnp.float32)   # nn.init.constant_(bias, 0)
    bn = dict(gamma=jnp.ones((out_channels,), jnp.float32),
              beta=jnp.zeros((out_channels,), jnp.float32),
              mean=jnp.zeros((out_channels,), jnp.float32),
              var=jnp.ones((out_channels,), jnp.float32))
    return {"conv_w": w, "conv_b": b, "bn": bn}


# Pure-JAX f32 reference (XLA conv) for a relaxed-tolerance sanity check.
def _reference(params, x_nchw, *, stride=2, pad=1):
    w = params["conv_w"]
    b = params["conv_b"]
    bn = params["bn"]
    y = jax.lax.conv_general_dilated(
        x_nchw, w, window_strides=(stride, stride),
        padding=((pad, pad), (pad, pad)),
        dimension_numbers=("NCHW", "OIHW", "NCHW"))
    y = y + b[None, :, None, None]
    scale = bn["gamma"] / jnp.sqrt(bn["var"] + BN_EPS)
    y = (y - bn["mean"][None, :, None, None]) * scale[None, :, None, None] \
        + bn["beta"][None, :, None, None]
    return jnp.maximum(y, 0.0)


if __name__ == "__main__":
    key = jax.random.PRNGKey(0)
    pkey, xkey = jax.random.split(key)

    in_channels, out_channels = 4, 32
    params = init_conv_block_params(pkey, in_channels, out_channels)
    x = jax.random.normal(xkey, (2, in_channels, 16, 16), jnp.float32)

    fwd = jax.jit(partial(conv_block_forward, params))
    y = fwd(x)
    jax.block_until_ready(y)

    assert y.shape == (2, out_channels, 8, 8), y.shape
    assert bool(jnp.all(y >= 0.0)), "ReLU output must be non-negative"

    # bf16-matmul vs f32 XLA reference: relaxed tolerance.
    y_ref = _reference(params, x)
    max_err = float(jnp.max(jnp.abs(y - y_ref)))
    assert max_err < 5e-2, f"max abs error vs reference too large: {max_err}"

    print("KERNEL_OK")
</pallas_src>

<mosaic_0001>
module attributes {stable_mosaic.version = 11 : i64} {
  func.func @_matmul_bias_relu_kernel(%arg0: i32, %arg1: i32, %arg2: i32, %arg3: memref<128x128xbf16, #tpu.memory_space<vmem>>, %arg4: memref<128x128xbf16, #tpu.memory_space<vmem>>, %arg5: memref<1x128xf32, #tpu.memory_space<vmem>>, %arg6: memref<128x128xf32, #tpu.memory_space<vmem>>, %arg7: memref<128x128xf32, #tpu.memory_space<vmem>>) attributes {dimension_semantics = [#tpu.dimension_semantics<parallel>, #tpu.dimension_semantics<parallel>, #tpu.dimension_semantics<arbitrary>], iteration_bounds = array<i64: 1, 1, 1>, scalar_prefetch = 0 : i64, scratch_operands = 1 : i64, tpu.core_type = #tpu.core_type<tc>, window_params = [{transform_indices = @transform_0, window_bounds = array<i64: 128, 128>}, {transform_indices = @transform_1, window_bounds = array<i64: 128, 128>}, {transform_indices = @transform_2, window_bounds = array<i64: 1, 128>}, {transform_indices = @transform_3, window_bounds = array<i64: 128, 128>}]} {
    %c0_i32 = arith.constant 0 : i32
    %0 = arith.cmpi eq, %arg2, %c0_i32 : i32
    %1 = arith.extui %0 : i1 to i32
    %c0_i32_0 = arith.constant 0 : i32
    %2 = arith.cmpi ne, %1, %c0_i32_0 : i32
    scf.if %2 {
      %cst_10 = arith.constant 0.000000e+00 : f32
      %12 = vector.broadcast %cst_10 : f32 to vector<128x128xf32>
      %c0_11 = arith.constant 0 : index
      %c0_12 = arith.constant 0 : index
      %13 = vector.load %arg7[%c0_11, %c0_12] : memref<128x128xf32, #tpu.memory_space<vmem>>, vector<128x128xf32>
      tpu.vector_store %arg7[%c0_11, %c0_12], %12 {strides = array<i32>} : memref<128x128xf32, #tpu.memory_space<vmem>>, vector<128x128xf32>,
    } else {
    }
    %c0 = arith.constant 0 : index
    %c0_1 = arith.constant 0 : index
    %3 = vector.load %arg7[%c0, %c0_1] : memref<128x128xf32, #tpu.memory_space<vmem>>, vector<128x128xf32>
    %c0_2 = arith.constant 0 : index
    %c0_3 = arith.constant 0 : index
    %4 = vector.load %arg3[%c0_2, %c0_3] : memref<128x128xbf16, #tpu.memory_space<vmem>>, vector<128x128xbf16>
    %c0_4 = arith.constant 0 : index
    %c0_5 = arith.constant 0 : index
    %5 = vector.load %arg4[%c0_4, %c0_5] : memref<128x128xbf16, #tpu.memory_space<vmem>>, vector<128x128xbf16>
    %cst = arith.constant dense<0.000000e+00> : vector<128x128xf32>
    %6 = tpu.matmul %4, %5, %cst {dimension_numbers = #tpu.dot_dimension_numbers<[1], [0], [0], [1], [0, 0, 1, 1], [], []>} : vector<128x128xbf16>, vector<128x128xbf16>, vector<128x128xf32> -> vector<128x128xf32>
    %7 = arith.addf %3, %6 : vector<128x128xf32>
    %c0_6 = arith.constant 0 : index
    %c0_7 = arith.constant 0 : index
    %8 = vector.load %arg7[%c0_6, %c0_7] : memref<128x128xf32, #tpu.memory_space<vmem>>, vector<128x128xf32>
    tpu.vector_store %arg7[%c0_6, %c0_7], %7 {strides = array<i32>} : memref<128x128xf32, #tpu.memory_space<vmem>>, vector<128x128xf32>,
    %c0_i32_8 = arith.constant 0 : i32
    %9 = arith.cmpi eq, %arg2, %c0_i32_8 : i32
    %10 = arith.extui %9 : i1 to i32
    %c0_i32_9 = arith.constant 0 : i32
    %11 = arith.cmpi ne, %10, %c0_i32_9 : i32
    scf.if %11 {
      %c0_10 = arith.constant 0 : index
      %c0_11 = arith.constant 0 : index
      %12 = vector.load %arg7[%c0_10, %c0_11] : memref<128x128xf32, #tpu.memory_space<vmem>>, vector<128x128xf32>
      %c0_12 = arith.constant 0 : index
      %c0_13 = arith.constant 0 : index
      %13 = vector.load %arg5[%c0_12, %c0_13] : memref<1x128xf32, #tpu.memory_space<vmem>>, vector<1x128xf32>
      %14 = vector.broadcast %13 : vector<1x128xf32> to vector<128x128xf32>
      %15 = arith.addf %12, %14 : vector<128x128xf32>
      %cst_14 = arith.constant 0.000000e+00 : f32
      %16 = vector.broadcast %cst_14 : f32 to vector<128x128xf32>
      %17 = arith.maximumf %15, %16 : vector<128x128xf32>
      %c0_15 = arith.constant 0 : index
      %c0_16 = arith.constant 0 : index
      %18 = vector.load %arg6[%c0_15, %c0_16] : memref<128x128xf32, #tpu.memory_space<vmem>>, vector<128x128xf32>
      tpu.vector_store %arg6[%c0_15, %c0_16], %17 {strides = array<i32>} : memref<128x128xf32, #tpu.memory_space<vmem>>, vector<128x128xf32>,
    } else {
    }
    return
  }
  func.func @transform_0(%arg0: i32, %arg1: i32, %arg2: i32) -> (i32, i32) {
    %c0_i32 = arith.constant 0 : i32
    return %arg0, %arg2 : i32, i32
  }
  func.func @transform_1(%arg0: i32, %arg1: i32, %arg2: i32) -> (i32, i32) {
    %c0_i32 = arith.constant 0 : i32
    return %arg2, %arg1 : i32, i32
  }
  func.func @transform_2(%arg0: i32, %arg1: i32, %arg2: i32) -> (i32, i32) {
    %c0_i32 = arith.constant 0 : i32
    %c0_i32_0 = arith.constant 0 : i32
    return %c0_i32, %arg1 : i32, i32
  }
  func.func @transform_3(%arg0: i32, %arg1: i32, %arg2: i32) -> (i32, i32) {
    %c0_i32 = arith.constant 0 : i32
    return %arg0, %arg1 : i32, i32
  }
}

</mosaic_0001>

<bundles_post_ra>
// kernel: conv_block_forward.1
= control target key start
LH: loop header
LB: loop body
LE: loop exit
PB: predicated region body
PF: predicated region fallthrough
CT: control target
= control target key end

     0   :  { %s598_s0 = inlined_call_operand.vmem [shape: bf16[128,128], index: 0, kind: input, shape index: {}]   ;;  %s599_s1 = inlined_call_operand.vmem [shape: bf16[128,128], index: 1, kind: input, shape index: {}]   ;;  %s600_s2 = inlined_call_operand.vmem [shape: f32[1,128], index: 2, kind: input, shape index: {}]   ;;  %s601_s3 = inlined_call_operand.hbm [shape: f32[128,128], index: 3, kind: output, shape index: {}]  }
   0x1   :  { %v483_v0 = vld [vmem:[%s599_s1 + $0x38] sm:$0xff]   ;;  %v484_v1 = vld [vmem:[%s599_s1 + $0x30] sm:$0xff]   ;;  %v485_v2 = vld [vmem:[%s599_s1 + $0x28] sm:$0xff]  }
   0x2   :  { %432 = vmatprep.subr.bf16.mxu0 %v483_v0  ;;  %464 = vmatprep.subr.bf16.mxu1 %v483_v0  ;;  %v486_v3 = vld [vmem:[%s599_s1 + $0x20] sm:$0xff]   ;;  %v487_v6 = vld [vmem:[%s599_s1 + $0x18] sm:$0xff]   ;;  %v488_v7 = vld [vmem:[%s599_s1 + $0x10] sm:$0xff]  }
   0x3   :  { %433 = vmatpush3.bf16.msra.mxu0 %v483_v0  ;;  %472 = vmatpush3.bf16.msra.mxu1 %v483_v0  ;;  %v491_v4 = vld [vmem:[%s598_s0] sm:$0xff]  }
   0x4   :  { %434 = vmatprep.subr.bf16.mxu0 %v484_v1  ;;  %465 = vmatprep.subr.bf16.mxu1 %v484_v1  ;;  %v492_v5 = vld [vmem:[%s598_s0 + $0x20] sm:$0xff]  }
   0x5   :  { %448 = vmatprep.mubr.bf16.mxu0 %v491_v4  ;;  %456 = vmatprep.mubr.bf16.mxu1 %v492_v5 }
   0x7   :  { %435 = vmatpush3.bf16.msra.mxu0 %v484_v1  ;;  %473 = vmatpush3.bf16.msra.mxu1 %v484_v1 }
   0x8   :  { %436 = vmatprep.subr.bf16.mxu0 %v485_v2  ;;  %466 = vmatprep.subr.bf16.mxu1 %v485_v2 }
   0xb   :  { %437 = vmatpush3.bf16.msra.mxu0 %v485_v2  ;;  %474 = vmatpush3.bf16.msra.mxu1 %v485_v2 }
   0xc   :  { %438 = vmatprep.subr.bf16.mxu0 %v486_v3  ;;  %467 = vmatprep.subr.bf16.mxu1 %v486_v3 }
   0xf   :  { %439 = vmatpush3.bf16.msra.mxu0 %v486_v3  ;;  %475 = vmatpush3.bf16.msra.mxu1 %v486_v3 }
  0x10   :  { %440 = vmatprep.subr.bf16.mxu0 %v487_v6  ;;  %468 = vmatprep.subr.bf16.mxu1 %v487_v6 }
  0x11   :  { %8 = vsyncpa [#allocation4], 0  ;;  %v489_v8 = vld [vmem:[%s599_s1 + $0x8] sm:$0xff]   ;;  %v490_v9 = vld [vmem:[%s599_s1] sm:$0xff]  }
  0x12   :  { %v493_v10 = vld [vmem:[%s598_s0 + $0x8] sm:$0xff]   ;;  %v495_v12 = vld [vmem:[%s598_s0 + $0x10] sm:$0xff]   ;;  %v497_v14 = vld [vmem:[%s598_s0 + $0x18] sm:$0xff]  }
  0x13   :  { %441 = vmatpush3.bf16.msra.mxu0 %v487_v6  ;;  %476 = vmatpush3.bf16.msra.mxu1 %v487_v6  ;;  %v494_v11 = vld [vmem:[%s598_s0 + $0x28] sm:$0xff]   ;;  %v496_v13 = vld [vmem:[%s598_s0 + $0x30] sm:$0xff]   ;;  %v498_v15 = vld [vmem:[%s598_s0 + $0x38] sm:$0xff]   ;;  %s521_s0 = smov [#allocation3]  }
  0x14   :  { %442 = vmatprep.subr.bf16.mxu0 %v488_v7  ;;  %469 = vmatprep.subr.bf16.mxu1 %v488_v7  ;;  %v415_v16 = vld [vmem:[%s600_s2] ss:$0 sm:$0xff]  ;;  %s388_s2 = sshll.u32 %s521_s0, 4  ;;  %s389_s2 = int_to_ptr.vmem [resolvable:$true] %s388_s2 }
  0x15   :  { %s499_s18 = scalar_lea.vmem %s389_s2, 2048  ;;  %p504_p1 = scmp.lt.s32.totalorder %s389_s2, %s389_s2 }
  0x16   :  { %p500_p0 = scmp.ne.s32.totalorder %s389_s2, %s499_s18  ;;  %p505_p2 = scmp.lt.s32.totalorder %s499_s18, %s499_s18 }
  0x17   :  { %443 = vmatpush3.bf16.msra.mxu0 %v488_v7  ;;  %477 = vmatpush3.bf16.msra.mxu1 %v488_v7 }
  0x18   :  { %444 = vmatprep.subr.bf16.mxu0 %v489_v8  ;;  %470 = vmatprep.subr.bf16.mxu1 %v489_v8  ;;  %p506_p3 = por %p505_p2, %p504_p1 }
  0x1a   :  { %p507_p4 = pnand %p506_p3, %p500_p0 }
  0x1b   :  { %445 = vmatpush3.bf16.msra.mxu0 %v489_v8  ;;  %478 = vmatpush3.bf16.msra.mxu1 %v489_v8 }
  0x1c   :  { %446 = vmatprep.subr.bf16.mxu0 %v490_v9  ;;  %471 = vmatprep.subr.bf16.mxu1 %v490_v9 }
  0x1f   :  { %447 = vmatpush3.bf16.msra.mxu0 %v490_v9  ;;  %479 = vmatpush3.bf16.msra.mxu1 %v490_v9 }
  0x22   :  { %449 = vmatmul.mubr.bf16.vlgmr.msra.gmra.mxu0 %v493_v10  ;;  %457 = vmatmul.mubr.bf16.vlgmr.msra.gmra.mxu1 %v494_v11 }
  0x23   :  { %452 = vmatprep.mubr.bf16.mxu0 %v495_v12  ;;  %460 = vmatprep.mubr.bf16.mxu1 %v496_v13 }
  0x2a   :  { %453 = vmatmul.mubr.bf16.gmra.mxu0 %v497_v14  ;;  %461 = vmatmul.mubr.bf16.gmra.mxu1 %v498_v15 }
  0xe2   :  { %v450_v17 = vpop.f32.mrf.mxu0  ;;  %v458_v18 = vpop.f32.mrf.mxu1 }
  0xe3   :  { %v337_v19 = vadd.f32 %v450_v17, %v415_v16  ;;  %v345_v20 = vadd.f32 %v458_v18, %v415_v16 }
  0xe4   :  { %v214_v21 = vpop.f32.mrf.mxu0  ;;  %v246_v22 = vpop.f32.mrf.mxu1 }
  0xe5   :  { %v353_v23 = vmax.f32 %v337_v19, 0.0  ;;  %v361_v24 = vmax.f32 %v345_v20, 0.0  ;;  %v335_v25 = vadd.f32 %v415_v16, %v214_v21  ;;  %v343_v26 = vadd.f32 %v415_v16, %v246_v22 }
  0xe6   :  { %v451_v27 = vpop.f32.mrf.mxu0  ;;  %v459_v28 = vpop.f32.mrf.mxu1 }
  0xe7   :  { %369 = vst [vmem:[#allocation3 + $0x10] sm:$0xff] %v353_v23  ;;  %377 = vst [vmem:[#allocation3 + $0x50] sm:$0xff] %v361_v24  ;;  %v351_v29 = vmax.f32 %v335_v25, 0.0  ;;  %v359_v30 = vmax.f32 %v343_v26, 0.0  ;;  %v338_v31 = vadd.f32 %v451_v27, %v415_v16  ;;  %v346_v32 = vadd.f32 %v459_v28, %v415_v16 }
  0xe8   :  { %v217_v33 = vpop.f32.mrf.mxu0  ;;  %v249_v34 = vpop.f32.mrf.mxu1 }
  0xe9   :  { %367 = vst [vmem:[#allocation3] sm:$0xff] %v351_v29  ;;  %375 = vst [vmem:[#allocation3 + $0x40] sm:$0xff] %v359_v30  ;;  %v354_v35 = vmax.f32 %v338_v31, 0.0  ;;  %v362_v36 = vmax.f32 %v346_v32, 0.0  ;;  %v336_v37 = vadd.f32 %v415_v16, %v217_v33  ;;  %v344_v38 = vadd.f32 %v415_v16, %v249_v34 }
  0xea   :  { %v454_v39 = vpop.f32.mrf.mxu0  ;;  %v462_v40 = vpop.f32.mrf.mxu1 }
  0xeb   :  { %370 = vst [vmem:[#allocation3 + $0x18] sm:$0xff] %v354_v35  ;;  %378 = vst [vmem:[#allocation3 + $0x58] sm:$0xff] %v362_v36  ;;  %v352_v41 = vmax.f32 %v336_v37, 0.0  ;;  %v360_v42 = vmax.f32 %v344_v38, 0.0  ;;  %v341_v43 = vadd.f32 %v454_v39, %v415_v16  ;;  %v349_v44 = vadd.f32 %v462_v40, %v415_v16 }
  0xec   :  { %v230_v45 = vpop.f32.mrf.mxu0  ;;  %v262_v46 = vpop.f32.mrf.mxu1 }
  0xed   :  { %368 = vst [vmem:[#allocation3 + $0x8] sm:$0xff] %v352_v41  ;;  %376 = vst [vmem:[#allocation3 + $0x48] sm:$0xff] %v360_v42  ;;  %v357_v47 = vmax.f32 %v341_v43, 0.0  ;;  %v365_v48 = vmax.f32 %v349_v44, 0.0  ;;  %v339_v49 = vadd.f32 %v415_v16, %v230_v45  ;;  %v347_v50 = vadd.f32 %v415_v16, %v262_v46 }
  0xee   :  { %v455_v51 = vpop.f32.mrf.mxu0  ;;  %v463_v52 = vpop.f32.mrf.mxu1 }
  0xef   :  { %373 = vst [vmem:[#allocation3 + $0x30] sm:$0xff] %v357_v47  ;;  %381 = vst [vmem:[#allocation3 + $0x70] sm:$0xff] %v365_v48  ;;  %v355_v53 = vmax.f32 %v339_v49, 0.0  ;;  %v363_v54 = vmax.f32 %v347_v50, 0.0  ;;  %v342_v55 = vadd.f32 %v455_v51, %v415_v16  ;;  %v350_v56 = vadd.f32 %v463_v52, %v415_v16 }
  0xf0   :  { %v233_v57 = vpop.f32.mrf.mxu0  ;;  %v265_v58 = vpop.f32.mrf.mxu1 }
  0xf1   :  { %371 = vst [vmem:[#allocation3 + $0x20] sm:$0xff] %v355_v53  ;;  %379 = vst [vmem:[#allocation3 + $0x60] sm:$0xff] %v363_v54  ;;  %v358_v59 = vmax.f32 %v342_v55, 0.0  ;;  %v366_v60 = vmax.f32 %v350_v56, 0.0  ;;  %v340_v61 = vadd.f32 %v415_v16, %v233_v57  ;;  %v348_v62 = vadd.f32 %v415_v16, %v265_v58 }
  0xf3   :  { %374 = vst [vmem:[#allocation3 + $0x38] sm:$0xff] %v358_v59  ;;  %382 = vst [vmem:[#allocation3 + $0x78] sm:$0xff] %v366_v60  ;;  %v356_v63 = vmax.f32 %v340_v61, 0.0  ;;  %v364_v0 = vmax.f32 %v348_v62, 0.0 }
  0xf5   :  { %372 = vst [vmem:[#allocation3 + $0x28] sm:$0xff] %v356_v63  ;;  %380 = vst [vmem:[#allocation3 + $0x68] sm:$0xff] %v364_v0 }
  0xf6   :  { %510 = shalt.err (!%p507_p4)
}
  0xf7   :  { %s522_s19 = smov 128   ;;  %s523_s20 = smov 8  }
  0xf8   :  { %394 = dma.vmem_to_hbm [thread:$0]  %s389_s2, 2048, %s601_s3, [#allocation4], %s522_s19, %s522_s19, %s523_s20  }
  0xf9   :  { %519 = dma.done.wait [#allocation4], 2048  }
  0xfa   :  { %520 = vsyncadd [#allocation4], 4294965248 }
  0xfb   :  { %398 = vsyncpa [#allocation4], 1 }

</bundles_post_ra>
